<compile_context>
chip_gen: v6e
topology: v6e:2x2x1
jax: 0.10.0
libtpu: 0.0.40
codegen_flags: <defaults>
</compile_context>

<pallas_src>
import numpy as np
import jax
import jax.numpy as jnp
from jax.experimental import pallas as pl
from jax.experimental.pallas import tpu as pltpu

LANES = 128


def _round_up(n, m):
    return ((n + m - 1) // m) * m


# --------------------------------- Pallas kernel -----------------------------------

def _sin_embed_kernel(x_ref, tab_ref, o_ref):
    """Fused sinusoidal embedding on one packed row tile.

    x_ref  : (R, P) f32 -- P original rows packed per lane-row (P = 128 // D).
    tab_ref: (2, L) f32 -- row 0: angular speeds tiled to L lanes ([w|w] repeated P times),
                           row 1: phase offsets ([0..0, pi/2..pi/2] repeated P times).
    o_ref  : (R, L)     -- packed embedding; lane g*D + d  ==  out[P*r + g, d].
    """
    R, L = o_ref.shape
    P = x_ref.shape[-1]
    D = L // P

    if P == 1:
        xb = x_ref[...]                                  # (R, 1): lane-broadcasts below
    else:
        # Broadcast x within D-lane groups: lanes [g*D, (g+1)*D) <- x[:, g].
        # Pure VPU (compare + select); no integer divide, no XLU/MXU needed.
        lane = jax.lax.broadcasted_iota(jnp.int32, (R, L), 1)
        xb = x_ref[:, 0:1]
        for g in range(1, P):
            xb = jnp.where(lane >= g * D, x_ref[:, g:g + 1], xb)

    # One transcendental per output element: cos(t) == sin(t + pi/2) (offset in tab row 1;
    # the sin half adds exactly 0.0 so it stays bit-identical to sin(x*w)).
    phase = xb * tab_ref[0:1, :] + tab_ref[1:2, :]
    o_ref[...] = jnp.sin(phase).astype(o_ref.dtype)


# --------------------------------- wrapper / module ---------------------------------

def make_sinusoidal_embedding(emb_min_freq=1.0, emb_max_freq=1000.0,
                              embedding_dims=32, out_dtype=jnp.float32):
    """Builds the forward fn; the buffer prep is the register_buffer analogue (host, once)."""
    D = embedding_dims
    assert D % 2 == 0, "embedding_dims must be even"
    half = D // 2

    freqs = np.exp(np.linspace(np.log(emb_min_freq), np.log(emb_max_freq), half))
    speeds = (2.0 * np.pi * freqs).astype(np.float32)                        # (half,)
    w_row = np.concatenate([speeds, speeds]).astype(np.float32)              # (D,)  [w|w]
    off_row = np.concatenate([np.zeros(half, np.float32),
                              np.full(half, np.pi / 2.0, np.float32)])       # (D,)  [0|pi/2]

    # Lane packing: P original output rows per 128-lane packed row (P = 4 for D = 32).
    pack = LANES // D if (D <= LANES and LANES % D == 0) else 1
    L = pack * D
    table = jnp.asarray(np.stack([np.tile(w_row, pack),
                                  np.tile(off_row, pack)]))                  # (2, L) f32

    def forward(x):
        if x.ndim == 1:
            x = x[:, None]
        x = x.astype(jnp.float32)
        B = x.shape[0]

        # Pad B to a multiple of the pack factor, then pack `pack` rows per lane-row.
        Bp = _round_up(B, pack)
        if Bp != B:
            x = jnp.pad(x, ((0, Bp - B), (0, 0)))
        Rp = Bp // pack
        xp = x.reshape(Rp, pack)

        # Row-tile policy (in packed rows).  <=1024 packed rows (4096 original): a single
        # grid step (launch/step-overhead bound regime).  Above that: ~2 tiles so v7x can
        # put one on each TensorCore; cap at 2048 packed rows (1 MiB per f32 out buffer).
        if Rp <= 1024:
            block = Rp                       # full-extent block (legal regardless of 8|Rp)
        else:
            block = min(2048, _round_up(pl.cdiv(Rp, 2), 8))
        grid = (pl.cdiv(Rp, block),)         # ragged last tile handled by Pallas

        out_p = pl.pallas_call(
            _sin_embed_kernel,
            out_shape=jax.ShapeDtypeStruct((Rp, L), out_dtype),
            grid=grid,
            in_specs=[
                pl.BlockSpec((block, pack), lambda i: (i, 0)),
                pl.BlockSpec((2, L), lambda i: (0, 0)),       # tiny constant (revisited) block
            ],
            out_specs=pl.BlockSpec((block, L), lambda i: (i, 0)),
            compiler_params=pltpu.CompilerParams(
                dimension_semantics=("parallel",),            # v7x: one tile per TensorCore
            ),
        )(xp, table)

        out = out_p.reshape(Bp, D)           # free row-major un-packing
        if Bp != B:
            out = out[:B]
        return out

    return forward


# -------------------------------- pure-JAX reference --------------------------------

def ref_forward(x, emb_min_freq=1.0, emb_max_freq=1000.0, embedding_dims=32):
    half = embedding_dims // 2
    freqs = np.exp(np.linspace(np.log(emb_min_freq), np.log(emb_max_freq), half))
    w = jnp.asarray(2.0 * np.pi * freqs, jnp.float32)[None, :]
    if x.ndim == 1:
        x = x[:, None]
    phase = x.astype(jnp.float32) * w
    return jnp.concatenate([jnp.sin(phase), jnp.cos(phase)], axis=-1)


# -------------------------------------- main ----------------------------------------

if __name__ == "__main__":
    D = 32
    embed = make_sinusoidal_embedding(1.0, 1000.0, D)

    key = jax.random.PRNGKey(0)
    k0, k1, k2 = jax.random.split(key, 3)

    # Tolerance note: cos is computed as sin(theta + pi/2).  For phases up to 2*pi*1000
    # the f32 rounding of (theta + pi/2) perturbs the argument by <~2.5e-4, so outputs can
    # differ from cos(theta) by that much (the f32 reference is itself only conditioned to
    # ~1e-4 at these phases).  The sin half is bit-identical.
    TOL = dict(atol=1e-3, rtol=1e-3)

    # 1-D noise-level vector (the common diffusion path), batch a multiple of the packing.
    x1 = jax.random.uniform(k0, (8,), jnp.float32)
    out1 = jax.block_until_ready(embed(x1))
    assert out1.shape == (8, D)
    np.testing.assert_allclose(np.asarray(out1), np.asarray(ref_forward(x1)), **TOL)

    # 2-D (B, 1) input with B NOT a multiple of 4 (exercises the pad/slice path).
    x2 = jax.random.uniform(k1, (6, 1), jnp.float32)
    out2 = jax.block_until_ready(embed(x2))
    assert out2.shape == (6, D)
    np.testing.assert_allclose(np.asarray(out2), np.asarray(ref_forward(x2)), **TOL)

    # Slightly larger ragged batch (still small), single grid step after packing.
    x3 = jax.random.uniform(k2, (37,), jnp.float32)
    out3 = jax.block_until_ready(embed(x3))
    assert out3.shape == (37, D)
    np.testing.assert_allclose(np.asarray(out3), np.asarray(ref_forward(x3)), **TOL)

    print("KERNEL_OK")
</pallas_src>

<mosaic_0001>
module attributes {stable_mosaic.version = 11 : i64} {
  func.func @_sin_embed_kernel(%arg0: i32, %arg1: memref<2x4xf32, #tpu.memory_space<vmem>>, %arg2: memref<2x128xf32, #tpu.memory_space<vmem>>, %arg3: memref<2x128xf32, #tpu.memory_space<vmem>>) attributes {dimension_semantics = [#tpu.dimension_semantics<parallel>], iteration_bounds = array<i64: 1>, scalar_prefetch = 0 : i64, scratch_operands = 0 : i64, tpu.core_type = #tpu.core_type<tc>, window_params = [{transform_indices = @transform_0, window_bounds = array<i64: 2, 4>}, {pipeline_mode = #tpu.pipeline_mode<synchronous>, transform_indices = @transform_1, window_bounds = array<i64: 2, 128>}, {transform_indices = @transform_2, window_bounds = array<i64: 2, 128>}]} {
    %0 = tpu.iota {dimensions = array<i32: 1>} : vector<2x128xi32>
    %c0 = arith.constant 0 : index
    %c0_0 = arith.constant 0 : index
    %1 = vector.load %arg1[%c0, %c0_0] : memref<2x4xf32, #tpu.memory_space<vmem>>, vector<2x1xf32>
    %c32_i32 = arith.constant 32 : i32
    %2 = vector.broadcast %c32_i32 : i32 to vector<2x128xi32>
    %3 = arith.cmpi sge, %0, %2 : vector<2x128xi32>
    %c0_1 = arith.constant 0 : index
    %c1 = arith.constant 1 : index
    %4 = vector.load %arg1[%c0_1, %c1] : memref<2x4xf32, #tpu.memory_space<vmem>>, vector<2x1xf32>
    %5 = vector.shape_cast %4 : vector<2x1xf32> to vector<2x1xf32>
    %6 = vector.broadcast %5 : vector<2x1xf32> to vector<2x128xf32>
    %7 = vector.shape_cast %1 : vector<2x1xf32> to vector<2x1xf32>
    %8 = vector.broadcast %7 : vector<2x1xf32> to vector<2x128xf32>
    %9 = arith.select %3, %6, %8 : vector<2x128xi1>, vector<2x128xf32>
    %c64_i32 = arith.constant 64 : i32
    %10 = vector.broadcast %c64_i32 : i32 to vector<2x128xi32>
    %11 = arith.cmpi sge, %0, %10 : vector<2x128xi32>
    %c0_2 = arith.constant 0 : index
    %c2 = arith.constant 2 : index
    %12 = vector.load %arg1[%c0_2, %c2] : memref<2x4xf32, #tpu.memory_space<vmem>>, vector<2x1xf32>
    %13 = vector.shape_cast %12 : vector<2x1xf32> to vector<2x1xf32>
    %14 = vector.broadcast %13 : vector<2x1xf32> to vector<2x128xf32>
    %15 = arith.select %11, %14, %9 : vector<2x128xi1>, vector<2x128xf32>
    %c96_i32 = arith.constant 96 : i32
    %16 = vector.broadcast %c96_i32 : i32 to vector<2x128xi32>
    %17 = arith.cmpi sge, %0, %16 : vector<2x128xi32>
    %c0_3 = arith.constant 0 : index
    %c3 = arith.constant 3 : index
    %18 = vector.load %arg1[%c0_3, %c3] : memref<2x4xf32, #tpu.memory_space<vmem>>, vector<2x1xf32>
    %19 = vector.shape_cast %18 : vector<2x1xf32> to vector<2x1xf32>
    %20 = vector.broadcast %19 : vector<2x1xf32> to vector<2x128xf32>
    %21 = arith.select %17, %20, %15 : vector<2x128xi1>, vector<2x128xf32>
    %c0_4 = arith.constant 0 : index
    %c0_5 = arith.constant 0 : index
    %22 = vector.load %arg2[%c0_4, %c0_5] : memref<2x128xf32, #tpu.memory_space<vmem>>, vector<1x128xf32>
    %23 = vector.broadcast %22 : vector<1x128xf32> to vector<2x128xf32>
    %24 = arith.mulf %21, %23 : vector<2x128xf32>
    %c1_6 = arith.constant 1 : index
    %c0_7 = arith.constant 0 : index
    %25 = vector.load %arg2[%c1_6, %c0_7] : memref<2x128xf32, #tpu.memory_space<vmem>>, vector<1x128xf32>
    %26 = vector.broadcast %25 : vector<1x128xf32> to vector<2x128xf32>
    %27 = arith.addf %24, %26 : vector<2x128xf32>
    %28 = math.sin %27 : vector<2x128xf32>
    %c0_8 = arith.constant 0 : index
    %c0_9 = arith.constant 0 : index
    %29 = vector.load %arg3[%c0_8, %c0_9] : memref<2x128xf32, #tpu.memory_space<vmem>>, vector<2x128xf32>
    tpu.vector_store %arg3[%c0_8, %c0_9], %28 {strides = array<i32>} : memref<2x128xf32, #tpu.memory_space<vmem>>, vector<2x128xf32>,
    return
  }
  func.func @transform_0(%arg0: i32) -> (i32, i32) {
    %c0_i32 = arith.constant 0 : i32
    %c0_i32_0 = arith.constant 0 : i32
    return %arg0, %c0_i32 : i32, i32
  }
  func.func @transform_1(%arg0: i32) -> (i32, i32) {
    %c0_i32 = arith.constant 0 : i32
    %c0_i32_0 = arith.constant 0 : i32
    %c0_i32_1 = arith.constant 0 : i32
    return %c0_i32, %c0_i32_0 : i32, i32
  }
  func.func @transform_2(%arg0: i32) -> (i32, i32) {
    %c0_i32 = arith.constant 0 : i32
    %c0_i32_0 = arith.constant 0 : i32
    return %arg0, %c0_i32 : i32, i32
  }
}

</mosaic_0001>

<bundles_post_ra>
// kernel: tpu_custom_call.1
= control target key start
LH: loop header
LB: loop body
LE: loop exit
PB: predicated region body
PF: predicated region fallthrough
CT: control target
= control target key end

     0   :  { %7 = vsyncpa [#allocation3], 0  ;;  %s351_s0 = inlined_call_operand.hbm [shape: f32[2,4], index: 0, kind: input, shape index: {}]   ;;  %s352_s1 = inlined_call_operand.hbm [shape: f32[2,128], index: 1, kind: input, shape index: {}]   ;;  %s353_s2 = inlined_call_operand.hbm [shape: f32[2,128], index: 2, kind: output, shape index: {}]  }
   0x1   :  { %8 = vsyncpa [#allocation6], 0 }
   0x2   :  { %9 = vsyncpa [#allocation4], 0  ;;  %s293_s9 = smov [#allocation2]   ;;  %s294_s11 = smov [#allocation5]  }
   0x3   :  { %s16_s10 = sshll.u32 %s293_s9, 4  ;;  %s26_s12 = sshll.u32 %s294_s11, 4  ;;  %s17_s10 = int_to_ptr.vmem [resolvable:$true] %s16_s10  ;;  %s27_s12 = int_to_ptr.vmem [resolvable:$true] %s26_s12 }
   0x4   :  { %s235_s13 = scalar_lea.vmem %s17_s10, 32  ;;  %p240_p1 = scmp.lt.s32.totalorder %s17_s10, %s17_s10 }
   0x5   :  { %p236_p0 = scmp.ne.s32.totalorder %s17_s10, %s235_s13  ;;  %p241_p2 = scmp.lt.s32.totalorder %s235_s13, %s235_s13 }
   0x7   :  { %p242_p3 = por %p241_p2, %p240_p1 }
   0x9   :  { %p243_p4 = pnand %p242_p3, %p236_p0 }
   0xb   :  { %246 = shalt.err (!%p243_p4)
}
   0xc   :  { %19 = dma.hbm_to_vmem [thread:$0]  %s351_s0, 32, %s17_s10, [#allocation3]  }
   0xd   :  { %s255_s16 = scalar_lea.vmem %s27_s12, 32  ;;  %p260_p6 = scmp.lt.s32.totalorder %s27_s12, %s27_s12 }
   0xe   :  { %p256_p5 = scmp.ne.s32.totalorder %s27_s12, %s255_s16  ;;  %p261_p7 = scmp.lt.s32.totalorder %s255_s16, %s255_s16 }
  0x10   :  { %p262_p8 = por %p261_p7, %p260_p6 }
  0x12   :  { %p263_p9 = pnand %p262_p8, %p256_p5 }
  0x14   :  { %266 = shalt.err (!%p263_p9)
}
  0x15   :  { %29 = dma.hbm_to_vmem [thread:$0]  %s352_s1, 32, %s27_s12, [#allocation6]  }
  0x16   :  { %287 = dma.done.wait [#allocation3], 32  }
  0x17   :  { %288 = vsyncadd [#allocation3], 4294967264 }
  0x18   :  { %289 = dma.done.wait [#allocation6], 32  }
  0x19   :  { %290 = vsyncadd [#allocation6], 4294967264  ;;  %v295_v0 = vmov 1   ;;  %v296_v1 = vmov 2   ;;  %v38_v2 = vld [vmem:[#allocation2] sm:$0x3]  ;;  %v36_v5 = vlaneseq }
  0x1a   :  { %218 = vset.pattern.permute.xlu0 %v295_v0  ;;  %220 = vset.pattern.permute.xlu1 %v296_v1  ;;  %v297_v3 = vmov 0   ;;  %v298_v4 = vmov 3   ;;  %v195_v12 = vld [vmem:[#allocation5] ss:$0 sm:$0xff]  ;;  %v196_v14 = vld [vmem:[#allocation5 + $0x1] ss:$0 sm:$0xff] }
  0x1b   :  { %42 = vperm.xlu0 %218, %v38_v2   ;;  %52 = vperm.xlu1 %220, %v38_v2   ;;  %v37_v6 = vand.u32 127, %v36_v5  ;;  %v299_v28 = vmov 683565275   ;;  %v300_v30 = vmov 2475754826   ;;  %s305_s0 = smov [#allocation7]  }
  0x1c   :  { %v301_v33 = vmov 2131351028   ;;  %v302_v36 = vmov 2102212464   ;;  %v303_v39 = vmov 920167782  }
  0x1d   :  { %vm39_vm0 = vcmp.ge.s32.totalorder %v37_v6, 32  ;;  %vm50_vm1 = vcmp.ge.s32.totalorder %v37_v6, 64  ;;  %vm56_vm2 = vcmp.ge.s32.totalorder %v37_v6, 96  ;;  %v304_v42 = vmov 1326507024   ;;  %s185_s1 = sshll.u32 %s305_s0, 4  ;;  %s186_s1 = int_to_ptr.vmem [resolvable:$true] %s185_s1 }
  0x1e   :  { %s267_s19 = scalar_lea.vmem %s186_s1, 32  ;;  %p272_p11 = scmp.lt.s32.totalorder %s186_s1, %s186_s1 }
  0x1f   :  { %219 = vset.pattern.permute.xlu0 %v297_v3  ;;  %221 = vset.pattern.permute.xlu1 %v298_v4  ;;  %p268_p10 = scmp.ne.s32.totalorder %s186_s1, %s267_s19  ;;  %p273_p12 = scmp.lt.s32.totalorder %s267_s19, %s267_s19 }
  0x20   :  { %46 = vperm.xlu0 %219, %v38_v2   ;;  %58 = vperm.xlu1 %221, %v38_v2  }
  0x21   :  { %p274_p13 = por %p273_p12, %p272_p11 }
  0x23   :  { %p275_p0 = pnand %p274_p13, %p268_p10 }
  0x24   :  { %222 = vset.pattern.permute.xlu0 %v298_v4 }
  0x96   :  { %v43_v7 = vpop.permute.xlu0 %42  ;;  %v53_v8 = vpop.permute.xlu1 %52 }
  0x9b   :  { %v47_v9 = vpop.permute.xlu0 %46  ;;  %v59_v10 = vpop.permute.xlu1 %58 }
  0x9c   :  { %v49_v11 = vsel %vm39_vm0, %v43_v7, %v47_v9 }
  0x9d   :  { %v55_v13 = vsel %vm50_vm1, %v53_v8, %v49_v11 }
  0x9e   :  { %v61_v15 = vsel %vm56_vm2, %v59_v10, %v55_v13 }
  0x9f   :  { %v67_v16 = vmul.f32 %v195_v12, %v61_v15 }
  0xa1   :  { %v327_v17 = vadd.f32 %v196_v14, %v67_v16 }
  0xa3   :  { %v77_v18 = vand.u32 2139095040, %v327_v17  ;;  %v74_v22 = vand.u32 2147483647, %v327_v17  ;;  %vm76_vm10 = vcmp.lt.s32.totalorder %v327_v17, 0  ;;  %vm166_vm15 = vweird.f32 %v327_v17 }
  0xa5   :  { %v78_v19 = vshrl.u32 %v77_v18, 23  ;;  %v81_v26 = vand.u32 8388607, %v74_v22  ;;  %vm75_vm11 = vcmp.le.f32.partialorder %v74_v22, 0.7853982 }
  0xa7   :  { %v197_v20 = vadd.s32 4294967169, %v78_v19  ;;  %v82_v44 = vor.u32 8388608, %v81_v26 }
  0xa9   :  { %v84_v21 = vadd.s32 1, %v197_v20  ;;  %v122_v58 = vshll.u32 %v82_v44, 8 }
  0xab   :  { %vm85_vm3 = vcmp.gt.s32.totalorder %v84_v21, 0 }
  0xac   :  { %v86_v23 = vsel %vm85_vm3, %v84_v21, 0 }
  0xad   :  { %v88_v24 = vand.u32 31, %v86_v23  ;;  %v87_v27 = vshrl.u32 %v86_v23, 5 }
  0xaf   :  { %v89_v25 = vsub.s32 32, %v88_v24  ;;  %v91_v29 = vshll.u32 %v299_v28, %v88_v24  ;;  %v94_v31 = vshll.u32 %v300_v30, %v88_v24  ;;  %v97_v35 = vshll.u32 %v301_v33, %v88_v24 }
  0xb0   :  { %v100_v38 = vshll.u32 %v302_v36, %v88_v24  ;;  %v103_v41 = vshll.u32 %v303_v39, %v88_v24  ;;  %vm106_vm4 = vcmp.lt.s32.totalorder %v87_v27, 1  ;;  %vm109_vm5 = vcmp.lt.s32.totalorder %v87_v27, 4 }
  0xb1   :  { %v92_v32 = vshrl.u32 %v300_v30, %v89_v25  ;;  %v95_v34 = vshrl.u32 %v301_v33, %v89_v25  ;;  %v98_v37 = vshrl.u32 %v302_v36, %v89_v25  ;;  %v101_v40 = vshrl.u32 %v303_v39, %v89_v25 }
  0xb2   :  { %v104_v43 = vshrl.u32 %v304_v42, %v89_v25  ;;  %v90_v53 = vshrl.u32 %v299_v28, %v89_v25  ;;  %vm108_vm6 = vcmp.lt.s32.totalorder %v87_v27, 3  ;;  %vm107_vm7 = vcmp.lt.s32.totalorder %v87_v27, 2 }
  0xb3   :  { %v93_v45 = vor.u32 %v92_v32, %v91_v29  ;;  %v96_v46 = vor.u32 %v95_v34, %v94_v31  ;;  %v99_v47 = vor.u32 %v98_v37, %v97_v35  ;;  %v102_v48 = vor.u32 %v101_v40, %v100_v38 }
  0xb4   :  { %v105_v49 = vor.u32 %v104_v43, %v103_v41 }
  0xb5   :  { %v111_v50 = vsel %vm109_vm5, %v99_v47, 2102212464  ;;  %v114_v51 = vsel %vm106_vm4, %v93_v45, %v96_v46  ;;  %v118_v52 = vsel %vm106_vm4, %v96_v46, %v99_v47  ;;  %v115_v54 = vsel %vm109_vm5, %v102_v48, 920167782 }
  0xb6   :  { %v119_v55 = vsel %vm109_vm5, %v105_v49, 1326507024  ;;  %v116_v56 = vsel %vm108_vm6, %v99_v47, %v115_v54  ;;  %v110_v59 = vsel %vm106_vm4, %v90_v53, %v93_v45  ;;  %v112_v60 = vsel %vm108_vm6, %v96_v46, %v111_v50 }
  0xb7   :  { %v120_v57 = vsel %vm108_vm6, %v102_v48, %v119_v55  ;;  %v117_v61 = vsel %vm107_vm7, %v114_v51, %v116_v56  ;;  %v113_v3 = vsel %vm107_vm7, %v110_v59, %v112_v60 }
  0xb8   :  { %v121_v62 = vsel %vm107_vm7, %v118_v52, %v120_v57  ;;  %v336_v1 = vmul.u32.u64.low %v122_v58, %v117_v61  ;;  %v337_v2 = vmul.u32.u64.high %v122_v58, %v117_v61, %v336_v1  ;;  %v129_v5 = vmul.u32 %v122_v58, %v113_v3 }
  0xb9   :  { %v333_v63 = vmul.u32.u64.low %v122_v58, %v121_v62  ;;  %v334_v0 = vmul.u32.u64.high %v122_v58, %v121_v62, %v333_v63 }
  0xba   :  { %v132_v4 = vadd.s32 1, %v337_v2 }
  0xbb   :  { %vm131_vm8 = vc.u32 %v334_v0, %v336_v1  ;;  %v130_v18 = vadd.s32 %v336_v1, %v334_v0 }
  0xbc   :  { %v133_v6 = vsel %vm131_vm8, %v132_v4, %v337_v2 }
  0xbd   :  { %v134_v7 = vadd.s32 %v133_v6, %v129_v5 }
  0xbf   :  { %v135_v8 = vadd.s32 536870912, %v134_v7 }
  0xc1   :  { %v136_v9 = vshrl.u32 %v135_v8, 30 }
  0xc3   :  { %v137_v10 = vshll.u32 %v136_v9, 30  ;;  %v160_v32 = vsub.s32 4, %v136_v9 }
  0xc5   :  { %v138_v11 = vsub.s32 %v134_v7, %v137_v10  ;;  %v161_v35 = vsel %vm76_vm10, %v160_v32, %v136_v9 }
  0xc6   :  { %v163_v36 = vsel %vm75_vm11, 0, %v161_v35 }
  0xc7   :  { %v140_v12 = vsub.s32 0, %v138_v11  ;;  %v167_v37 = vadd.s32 3, %v163_v36 }
  0xc9   :  { %v198_v13 = vmin.u32 %v140_v12, %v138_v11  ;;  %v168_v38 = vand.u32 3, %v167_v37 }
  0xcb   :  { %v142_v14 = vclz %v198_v13  ;;  %vm173_vm12 = vcmp.eq.s32.totalorder %v168_v38, 2  ;;  %vm170_vm13 = vcmp.eq.s32.totalorder %v168_v38, 0  ;;  %vm169_vm14 = vcmp.lt.s32.totalorder %v168_v38, 2 }
  0xcd   :  { %v199_v15 = vadd.s32 4294967294, %v142_v14 }
  0xcf   :  { %vm200_vm9 = vcmp.lt.s32.totalorder %v199_v15, 0 }
  0xd0   :  { %v145_v16 = vsel %vm200_vm9, 0, %v199_v15 }
  0xd1   :  { %v146_v19 = vsub.s32 32, %v145_v16  ;;  %v150_v20 = vsub.s32 4294967266, %v145_v16  ;;  %v147_v21 = vshll.u32 %v138_v11, %v145_v16 }
  0xd3   :  { %v148_v23 = vshrl.u32 %v130_v18, %v146_v19  ;;  %v151_v24 = vadd.s32 127, %v150_v20 }
  0xd5   :  { %v149_v25 = vor.u32 %v148_v23, %v147_v21  ;;  %v152_v26 = vshll.u32 %v151_v24, 23 }
  0xd7   :  { %v153_v27 = vor.u32 4788187, %v152_v26  ;;  %v156_v29 = vcvt.s32.f32 %v149_v25 }
  0xd9   :  { %v154_v28 = vand.u32 2147483647, %v153_v27 }
  0xdb   :  { %v157_v30 = vmul.f32 %v156_v29, %v154_v28 }
  0xdd   :  { %v158_v31 = vxor.u32 2147483648, %v157_v30 }
  0xdf   :  { %v159_v33 = vsel %vm76_vm10, %v158_v31, %v157_v30 }
  0xe0   :  { %v162_v34 = vsel %vm75_vm11, %v327_v17, %v159_v33 }
  0xe1   :  { %223 = vcosq.f32 %v162_v34 }
  0xe2   :  { %225 = vsinq.f32 %v162_v34 }
  0xee   :  { %v224_v39 = vpop.eup %223 }
  0xef   :  { %v226_v40 = vpop.eup %225  ;;  %v174_v41 = vxor.u32 2147483648, %v224_v39 }
  0xf0   :  { %v171_v42 = vxor.u32 2147483648, %v226_v40 }
  0xf1   :  { %v175_v43 = vsel %vm173_vm12, %v174_v41, %v226_v40 }
  0xf2   :  { %v172_v22 = vsel %vm170_vm13, %v224_v39, %v171_v42 }
  0xf3   :  { %v176_v44 = vsel %vm169_vm14, %v172_v22, %v175_v43 }
  0xf4   :  { %v177_v45 = vsel %vm166_vm15, nan, %v176_v44 }
  0xf5   :  { %178 = vst [vmem:[#allocation7] sm:$0x3] %v177_v45 }
  0xf6   :  { %278 = shalt.err (!%p275_p0)
}
  0xf7   :  { %188 = dma.vmem_to_hbm [thread:$0]  %s186_s1, 32, %s353_s2, [#allocation4]  }
  0xf8   :  { %291 = dma.done.wait [#allocation4], 32  }
  0xf9   :  { %292 = vsyncadd [#allocation4], 4294967264 }
  0xfa   :  { %192 = vsyncpa [#allocation3], 1 }
  0xfb   :  { %193 = vsyncpa [#allocation6], 1 }
  0xfc   :  { %194 = vsyncpa [#allocation4], 1 }

</bundles_post_ra>
